<compile_context>
chip_gen: v7x
topology: tpu7x:2x2x1
jax: 0.10.0
libtpu: 0.0.40
codegen_flags: <defaults>
</compile_context>

<pallas_src>
import functools

import jax
import jax.numpy as jnp
from jax.experimental import pallas as pl
from jax.experimental.pallas import tpu as pltpu

HIDDEN = 360


def _round_up(n, m):
    return ((n + m - 1) // m) * m


# ----------------------------- kernels -----------------------------------

def _linreg_kernel(x_ref, w1_ref, b1_ref, w2_ref, b2_ref, o_ref, *, cast_dtype):
    x = x_ref[...]
    if cast_dtype is not None:
        x = x.astype(cast_dtype)          # in-kernel cast: VPU work, hides under MXU/DMA
    # Layer 1: (TB, Din) @ (Din, Hp) with f32 MXU accumulation.
    h = jnp.dot(x, w1_ref[...], preferred_element_type=jnp.float32)
    h = h + b1_ref[...]                   # f32 bias epilogue (VPU filler)
    h = h.astype(w2_ref.dtype)            # bf16 re-cast when bf16 path is on
    # Layer 2: (TB, Hp) @ (Hp, Dp) with f32 MXU accumulation.
    out = jnp.dot(h, w2_ref[...], preferred_element_type=jnp.float32)
    out = out + b2_ref[...]
    o_ref[...] = out.astype(o_ref.dtype)


def _linreg_kernel_ksplit(x_ref, w1_ref, b1_ref, w2_ref, b2_ref, o_ref, acc_ref,
                          *, cast_dtype):
    k = pl.program_id(1)

    @pl.when(k == 0)
    def _():
        acc_ref[...] = jnp.zeros_like(acc_ref)

    x = x_ref[...]
    if cast_dtype is not None:
        x = x.astype(cast_dtype)
    acc_ref[...] += jnp.dot(x, w1_ref[...], preferred_element_type=jnp.float32)

    @pl.when(k == pl.num_programs(1) - 1)
    def _():
        h = acc_ref[...] + b1_ref[...]
        h = h.astype(w2_ref.dtype)
        out = jnp.dot(h, w2_ref[...], preferred_element_type=jnp.float32)
        o_ref[...] = (out + b2_ref[...]).astype(o_ref.dtype)


# ----------------------------- wrapper ------------------------------------

def linear_regression_forward(x, w1_t, b1, w2_t, b2, *,
                              block_b=1024,
                              use_bf16_matmul=False,
                              out_dtype=None,
                              k_split_din=4096,
                              k_block=None,
                              vmem_budget_bytes=48 * 1024 * 1024):
    """Forward pass of LinearRegression.

    x:    (B, Din) float32
    w1_t: (Din, H) float32   (W1 transposed, H == 360)
    b1:   (H,)     float32
    w2_t: (H, Dout) float32  (W2 transposed)
    b2:   (Dout,)  float32
    returns (B, Dout) out_dtype (default float32)
    """
    B, Din = x.shape
    H = w1_t.shape[1]
    Dout = w2_t.shape[1]
    out_dtype = jnp.float32 if out_dtype is None else out_dtype

    # ---- pad weights/biases to hardware-friendly shapes (exact: zero pad) ----
    Hp = _round_up(H, 128)            # 360 -> 384
    Dp = _round_up(Dout, 128)         # lane-dense output -> unmasked stores
    w_dtype = jnp.bfloat16 if use_bf16_matmul else w1_t.dtype
    w1p = jnp.pad(w1_t, ((0, 0), (0, Hp - H))).astype(w_dtype)
    b1p = jnp.pad(b1, (0, Hp - H)).reshape(1, Hp).astype(jnp.float32)
    w2p = jnp.pad(w2_t, ((0, Hp - H), (0, Dp - Dout))).astype(w_dtype)
    b2p = jnp.pad(b2, (0, Dp - Dout)).reshape(1, Dp).astype(jnp.float32)
    cast_dtype = jnp.bfloat16 if use_bf16_matmul else None

    # ---- x is streamed unpadded; only a tiny row pad when B < 8 ----
    if B < 8:
        x_in = jnp.pad(x, ((0, 8 - B), (0, 0)))
        Brows = 8
    else:
        x_in = x
        Brows = B

    # ---- K (Din) split decision: only when exact (no ragged accumulation) ----
    if (k_block is not None and k_block % 128 == 0
            and Din % k_block == 0 and k_block < Din):
        use_ksplit, TK = True, k_block
    elif Din >= k_split_din and Din % 128 == 0:
        use_ksplit, TK = True, 128
        for cand in (512, 384, 256):
            if Din % cand == 0:
                TK = cand
                break
    else:
        use_ksplit, TK = False, Din

    # ---- batch tile: >=4 grid steps when B allows (megacore), VMEM-bounded ----
    TB = min(block_b, max(8, _round_up(pl.cdiv(Brows, 4), 8)))

    x_isz = jnp.dtype(x.dtype).itemsize
    w_isz = jnp.dtype(w_dtype).itemsize
    o_isz = jnp.dtype(out_dtype).itemsize

    def vmem_estimate(tb):
        est = 2 * tb * TK * x_isz              # x tiles (double-buffered)
        est += 2 * tb * Dp * o_isz             # out tiles (double-buffered)
        est += tb * Hp * 4                     # f32 intermediate / accumulator
        if use_ksplit:
            est += 2 * TK * Hp * w_isz         # w1 streamed over K
        else:
            est += TK * Hp * w_isz             # w1 resident (single buffer)
        est += Hp * Dp * w_isz                 # w2 resident (single buffer)
        est += (Hp + Dp) * 4                   # biases
        return est

    while TB > 8 and vmem_estimate(TB) > vmem_budget_bytes:
        TB = max(8, _round_up(TB // 2, 8))

    nb = pl.cdiv(Brows, TB)

    vmem_limit = int(min(64 * 1024 * 1024,
                         max(vmem_estimate(TB) + (4 << 20), 32 << 20)))

    cost = pl.CostEstimate(
        flops=int(2 * B * (Din * Hp + Hp * Dp)),
        transcendentals=0,
        bytes_accessed=int(x.size * x_isz
                           + w1p.size * w_isz + w2p.size * w_isz
                           + (Hp + Dp) * 4
                           + Brows * Dp * o_isz),
    )

    if not use_ksplit:
        kernel = functools.partial(_linreg_kernel, cast_dtype=cast_dtype)
        out_padded = pl.pallas_call(
            kernel,
            out_shape=jax.ShapeDtypeStruct((Brows, Dp), out_dtype),
            grid=(nb,),
            in_specs=[
                pl.BlockSpec((TB, Din), lambda i: (i, 0)),      # batch-tiled x
                pl.BlockSpec((Din, Hp), lambda i: (0, 0),       # resident weights,
                             pipeline_mode=pl.Buffered(1)),     # single buffer
                pl.BlockSpec((1, Hp), lambda i: (0, 0),
                             pipeline_mode=pl.Buffered(1)),
                pl.BlockSpec((Hp, Dp), lambda i: (0, 0),
                             pipeline_mode=pl.Buffered(1)),
                pl.BlockSpec((1, Dp), lambda i: (0, 0),
                             pipeline_mode=pl.Buffered(1)),
            ],
            out_specs=pl.BlockSpec((TB, Dp), lambda i: (i, 0)),
            compiler_params=pltpu.CompilerParams(
                dimension_semantics=("parallel",),
                vmem_limit_bytes=vmem_limit,
            ),
            cost_estimate=cost,
        )(x_in, w1p, b1p, w2p, b2p)
    else:
        nk = Din // TK
        kernel = functools.partial(_linreg_kernel_ksplit, cast_dtype=cast_dtype)
        out_padded = pl.pallas_call(
            kernel,
            out_shape=jax.ShapeDtypeStruct((Brows, Dp), out_dtype),
            grid=(nb, nk),
            in_specs=[
                pl.BlockSpec((TB, TK), lambda i, k: (i, k)),    # x: batch x K tiles
                pl.BlockSpec((TK, Hp), lambda i, k: (k, 0)),    # w1 streamed over K
                pl.BlockSpec((1, Hp), lambda i, k: (0, 0),
                             pipeline_mode=pl.Buffered(1)),
                pl.BlockSpec((Hp, Dp), lambda i, k: (0, 0),
                             pipeline_mode=pl.Buffered(1)),
                pl.BlockSpec((1, Dp), lambda i, k: (0, 0),
                             pipeline_mode=pl.Buffered(1)),
            ],
            out_specs=pl.BlockSpec((TB, Dp), lambda i, k: (i, 0)),
            scratch_shapes=[pltpu.VMEM((TB, Hp), jnp.float32)],
            compiler_params=pltpu.CompilerParams(
                dimension_semantics=("parallel", "arbitrary"),
                vmem_limit_bytes=vmem_limit,
            ),
            cost_estimate=cost,
        )(x_in, w1p, b1p, w2p, b2p)

    if Brows != B or Dp != Dout:
        out_padded = out_padded[:B, :Dout]
    return out_padded


def init_params(key, dim_input, dim_output, hidden=HIDDEN):
    """PyTorch-style uniform(-1/sqrt(fan_in), 1/sqrt(fan_in)) init."""
    k1, k2, k3, k4 = jax.random.split(key, 4)
    bound1 = 1.0 / jnp.sqrt(dim_input)
    bound2 = 1.0 / jnp.sqrt(hidden)
    # Stored already transposed to (in, out) for the kernel.
    w1_t = jax.random.uniform(k1, (dim_input, hidden), jnp.float32, -bound1, bound1)
    b1 = jax.random.uniform(k2, (hidden,), jnp.float32, -bound1, bound1)
    w2_t = jax.random.uniform(k3, (hidden, dim_output), jnp.float32, -bound2, bound2)
    b2 = jax.random.uniform(k4, (dim_output,), jnp.float32, -bound2, bound2)
    return w1_t, b1, w2_t, b2


if __name__ == "__main__":
    key = jax.random.PRNGKey(0)
    k_x, k_p, k_x3, k_p3 = jax.random.split(key, 4)

    # ---- test 1: small shapes, f32 path (bit-accurate vs. reference) ----
    batch, dim_input, dim_output = 8, 32, 8
    x = jax.random.normal(k_x, (batch, dim_input), jnp.float32)
    w1_t, b1, w2_t, b2 = init_params(k_p, dim_input, dim_output)

    out = linear_regression_forward(x, w1_t, b1, w2_t, b2)
    out = jax.block_until_ready(out)
    ref = (x @ w1_t + b1) @ w2_t + b2
    assert out.shape == (batch, dim_output)
    assert jnp.allclose(out, ref, atol=1e-4, rtol=1e-4)

    # ---- test 2: bf16-matmul fast path (in-kernel cast), looser tolerance ----
    out_bf16 = linear_regression_forward(x, w1_t, b1, w2_t, b2,
                                         use_bf16_matmul=True)
    out_bf16 = jax.block_until_ready(out_bf16)
    assert out_bf16.shape == (batch, dim_output)
    assert jnp.allclose(out_bf16, ref, atol=5e-2, rtol=5e-2)

    # ---- test 3: Din-reduction path + ragged batch (60 rows, 16-row tiles) ----
    batch3, din3, dout3 = 60, 256, 8
    x3 = jax.random.normal(k_x3, (batch3, din3), jnp.float32)
    w1_t3, b1_3, w2_t3, b2_3 = init_params(k_p3, din3, dout3)
    out3 = linear_regression_forward(x3, w1_t3, b1_3, w2_t3, b2_3, k_block=128)
    out3 = jax.block_until_ready(out3)
    ref3 = (x3 @ w1_t3 + b1_3) @ w2_t3 + b2_3
    assert out3.shape == (batch3, dout3)
    assert jnp.allclose(out3, ref3, atol=1e-4, rtol=1e-4)

    print("KERNEL_OK")
</pallas_src>

<mosaic_0001>
module attributes {stable_mosaic.version = 11 : i64} {
  func.func @_linreg_kernel(%arg0: i32, %arg1: memref<8x32xf32, #tpu.memory_space<vmem>>, %arg2: memref<32x384xf32, #tpu.memory_space<vmem>>, %arg3: memref<1x384xf32, #tpu.memory_space<vmem>>, %arg4: memref<384x128xf32, #tpu.memory_space<vmem>>, %arg5: memref<1x128xf32, #tpu.memory_space<vmem>>, %arg6: memref<8x128xf32, #tpu.memory_space<vmem>>) attributes {dimension_semantics = [#tpu.dimension_semantics<parallel>], iteration_bounds = array<i64: 1>, scalar_prefetch = 0 : i64, scratch_operands = 0 : i64, tpu.core_type = #tpu.core_type<tc>, window_params = [{transform_indices = @transform_0, window_bounds = array<i64: 8, 32>}, {pipeline_mode = #tpu.pipeline_mode<synchronous>, transform_indices = @transform_1, window_bounds = array<i64: 32, 384>}, {pipeline_mode = #tpu.pipeline_mode<synchronous>, transform_indices = @transform_2, window_bounds = array<i64: 1, 384>}, {pipeline_mode = #tpu.pipeline_mode<synchronous>, transform_indices = @transform_3, window_bounds = array<i64: 384, 128>}, {pipeline_mode = #tpu.pipeline_mode<synchronous>, transform_indices = @transform_4, window_bounds = array<i64: 1, 128>}, {transform_indices = @transform_5, window_bounds = array<i64: 8, 128>}]} {
    %c0 = arith.constant 0 : index
    %c0_0 = arith.constant 0 : index
    %0 = vector.load %arg1[%c0, %c0_0] : memref<8x32xf32, #tpu.memory_space<vmem>>, vector<8x32xf32>
    %c0_1 = arith.constant 0 : index
    %c0_2 = arith.constant 0 : index
    %1 = vector.load %arg2[%c0_1, %c0_2] : memref<32x384xf32, #tpu.memory_space<vmem>>, vector<32x384xf32>
    %cst = arith.constant dense<0.000000e+00> : vector<8x384xf32>
    %2 = tpu.matmul %0, %1, %cst {dimension_numbers = #tpu.dot_dimension_numbers<[1], [0], [0], [1], [0, 0, 1, 1], [], []>} : vector<8x32xf32>, vector<32x384xf32>, vector<8x384xf32> -> vector<8x384xf32>
    %c0_3 = arith.constant 0 : index
    %c0_4 = arith.constant 0 : index
    %3 = vector.load %arg3[%c0_3, %c0_4] : memref<1x384xf32, #tpu.memory_space<vmem>>, vector<1x384xf32>
    %4 = vector.broadcast %3 : vector<1x384xf32> to vector<8x384xf32>
    %5 = arith.addf %2, %4 : vector<8x384xf32>
    %c0_5 = arith.constant 0 : index
    %c0_6 = arith.constant 0 : index
    %6 = vector.load %arg4[%c0_5, %c0_6] : memref<384x128xf32, #tpu.memory_space<vmem>>, vector<384x128xf32>
    %cst_7 = arith.constant dense<0.000000e+00> : vector<8x128xf32>
    %7 = tpu.matmul %5, %6, %cst_7 {dimension_numbers = #tpu.dot_dimension_numbers<[1], [0], [0], [1], [0, 0, 1, 1], [], []>} : vector<8x384xf32>, vector<384x128xf32>, vector<8x128xf32> -> vector<8x128xf32>
    %c0_8 = arith.constant 0 : index
    %c0_9 = arith.constant 0 : index
    %8 = vector.load %arg5[%c0_8, %c0_9] : memref<1x128xf32, #tpu.memory_space<vmem>>, vector<1x128xf32>
    %9 = vector.broadcast %8 : vector<1x128xf32> to vector<8x128xf32>
    %10 = arith.addf %7, %9 : vector<8x128xf32>
    %c0_10 = arith.constant 0 : index
    %c0_11 = arith.constant 0 : index
    %11 = vector.load %arg6[%c0_10, %c0_11] : memref<8x128xf32, #tpu.memory_space<vmem>>, vector<8x128xf32>
    tpu.vector_store %arg6[%c0_10, %c0_11], %10 {strides = array<i32>} : memref<8x128xf32, #tpu.memory_space<vmem>>, vector<8x128xf32>,
    return
  }
  func.func @transform_0(%arg0: i32) -> (i32, i32) {
    %c0_i32 = arith.constant 0 : i32
    %c0_i32_0 = arith.constant 0 : i32
    return %arg0, %c0_i32 : i32, i32
  }
  func.func @transform_1(%arg0: i32) -> (i32, i32) {
    %c0_i32 = arith.constant 0 : i32
    %c0_i32_0 = arith.constant 0 : i32
    %c0_i32_1 = arith.constant 0 : i32
    return %c0_i32, %c0_i32_0 : i32, i32
  }
  func.func @transform_2(%arg0: i32) -> (i32, i32) {
    %c0_i32 = arith.constant 0 : i32
    %c0_i32_0 = arith.constant 0 : i32
    %c0_i32_1 = arith.constant 0 : i32
    return %c0_i32, %c0_i32_0 : i32, i32
  }
  func.func @transform_3(%arg0: i32) -> (i32, i32) {
    %c0_i32 = arith.constant 0 : i32
    %c0_i32_0 = arith.constant 0 : i32
    %c0_i32_1 = arith.constant 0 : i32
    return %c0_i32, %c0_i32_0 : i32, i32
  }
  func.func @transform_4(%arg0: i32) -> (i32, i32) {
    %c0_i32 = arith.constant 0 : i32
    %c0_i32_0 = arith.constant 0 : i32
    %c0_i32_1 = arith.constant 0 : i32
    return %c0_i32, %c0_i32_0 : i32, i32
  }
  func.func @transform_5(%arg0: i32) -> (i32, i32) {
    %c0_i32 = arith.constant 0 : i32
    %c0_i32_0 = arith.constant 0 : i32
    return %arg0, %c0_i32 : i32, i32
  }
}

</mosaic_0001>

<bundles_post_ra>
// kernel: tpu_custom_call.1
= control target key start
LH: loop header
LB: loop body
LE: loop exit
PB: predicated region body
PF: predicated region fallthrough
CT: control target
= control target key end

     0   :  { %10 = vsyncpa [#allocation3], 0  ;;  %s840_s0 = inlined_call_operand.hbm [shape: f32[8,32], index: 0, kind: input, shape index: {}]   ;;  %s841_s1 = inlined_call_operand.hbm [shape: f32[32,384], index: 1, kind: input, shape index: {}]   ;;  %s842_s2 = inlined_call_operand.vmem [shape: f32[1,384], index: 2, kind: input, shape index: {}]   ;;  %s843_s3 = inlined_call_operand.hbm [shape: f32[384,128], index: 3, kind: input, shape index: {}]   ;;  %s844_s4 = inlined_call_operand.vmem [shape: f32[1,128], index: 4, kind: input, shape index: {}]   ;;  %s845_s5 = inlined_call_operand.hbm [shape: f32[8,128], index: 5, kind: output, shape index: {}]  }
   0x1   :  { %11 = vsyncpa [#allocation6], 0 }
   0x2   :  { %12 = vsyncpa [#allocation4], 0  ;;  %s728_s18 = smov [#allocation5]   ;;  %s634_s22 = scalar_lea.hbm %s841_s1, 1536 }
   0x3   :  { %s28_s19 = sshll.u32 %s728_s18, 4  ;;  %p635_p0 = scmp.ne.s32.totalorder %s841_s1, %s634_s22  ;;  %s29_s19 = int_to_ptr.vmem [resolvable:$true] %s28_s19 }
   0x4   :  { %p638_p1 = scmp.lt.u32.totalorder %s634_s22, %s841_s1 }
   0x6   :  { %p640_p2 = pnand %p638_p1, %p635_p0 }
   0x8   :  { %643 = shalt.err (!%p640_p2)
}
   0x9   :  { %s644_s27 = scalar_lea.vmem %s29_s19, 1536  ;;  %p649_p4 = scmp.lt.s32.totalorder %s29_s19, %s29_s19 }
   0xa   :  { %p645_p3 = scmp.ne.s32.totalorder %s29_s19, %s644_s27  ;;  %p650_p5 = scmp.lt.s32.totalorder %s644_s27, %s644_s27 }
   0xc   :  { %p651_p6 = por %p650_p5, %p649_p4 }
   0xe   :  { %p652_p7 = pnand %p651_p6, %p645_p3 }
  0x10   :  { %655 = shalt.err (!%p652_p7)
}
  0x11   :  { %s729_s28 = smov 384   ;;  %s730_s29 = smov 24  }
  0x12   :  { %34 = dma.hbm_to_vmem [thread:$0]  %s841_s1, 1536, %s29_s19, [#allocation6], %s729_s28, %s729_s28, %s730_s29  }
  0x13   :  { %s731_s7 = smov [#allocation2]   ;;  %s732_s9 = smov [#allocation7]  }
  0x14   :  { %s19_s8 = sshll.u32 %s731_s7, 4  ;;  %s42_s10 = sshll.u32 %s732_s9, 4  ;;  %s20_s8 = int_to_ptr.vmem [resolvable:$true] %s19_s8  ;;  %s43_s10 = int_to_ptr.vmem [resolvable:$true] %s42_s10 }
  0x15   :  { %s656_s13 = scalar_lea.hbm %s840_s0, 128 }
  0x16   :  { %p657_p8 = scmp.ne.s32.totalorder %s840_s0, %s656_s13  ;;  %p660_p9 = scmp.lt.u32.totalorder %s656_s13, %s840_s0 }
  0x18   :  { %p662_p10 = pnand %p660_p9, %p657_p8 }
  0x1a   :  { %665 = shalt.err (!%p662_p10)
}
  0x1b   :  { %s666_s1 = scalar_lea.vmem %s20_s8, 128  ;;  %p671_p12 = scmp.lt.s32.totalorder %s20_s8, %s20_s8 }
  0x1c   :  { %p667_p11 = scmp.ne.s32.totalorder %s20_s8, %s666_s1  ;;  %p672_p13 = scmp.lt.s32.totalorder %s666_s1, %s666_s1 }
  0x1e   :  { %p673_p0 = por %p672_p13, %p671_p12 }
  0x20   :  { %p674_p1 = pnand %p673_p0, %p667_p11 }
  0x22   :  { %677 = shalt.err (!%p674_p1)
}
  0x23   :  { %22 = dma.hbm_to_vmem [thread:$0]  %s840_s0, 128, %s20_s8, [#allocation3]  }
  0x24   :  { %s678_s22 = scalar_lea.hbm %s843_s3, 6144 }
  0x25   :  { %p679_p2 = scmp.ne.s32.totalorder %s843_s3, %s678_s22  ;;  %p682_p3 = scmp.lt.u32.totalorder %s678_s22, %s843_s3 }
  0x27   :  { %p684_p4 = pnand %p682_p3, %p679_p2 }
  0x29   :  { %687 = shalt.err (!%p684_p4)
}
  0x2a   :  { %s688_s27 = scalar_lea.vmem %s43_s10, 6144  ;;  %p693_p6 = scmp.lt.s32.totalorder %s43_s10, %s43_s10 }
  0x2b   :  { %p689_p5 = scmp.ne.s32.totalorder %s43_s10, %s688_s27  ;;  %p694_p7 = scmp.lt.s32.totalorder %s688_s27, %s688_s27 }
  0x2d   :  { %p695_p8 = por %p694_p7, %p693_p6 }
  0x2f   :  { %p696_p9 = pnand %p695_p8, %p689_p5 }
  0x31   :  { %699 = shalt.err (!%p696_p9)
}
  0x32   :  { %s733_s0 = smov 128   ;;  %s734_s28 = smov 8  }
  0x33   :  { %48 = dma.hbm_to_vmem [thread:$0]  %s843_s3, 6144, %s43_s10, [#allocation6], %s733_s0, %s733_s0, %s734_s28  }
  0x34   :  { %722 = dma.done.wait [#allocation3], 128  }
  0x35   :  { %723 = vsyncadd [#allocation3], 4294967168 }
  0x36   :  { %724 = dma.done.wait [#allocation6], 7680  }
  0x37   :  { %725 = vsyncadd [#allocation6], 4294959616  ;;  %v735_v0 = vmov 0.0|0.0   ;;  %v736_v1 = vmov 0.0   ;;  %vm737_vm0 = vmmov 0   ;;  %v62_v2 = vld [vmem:[#allocation5 + $0x8] sm:$0xff] }
  0x38   :  { %561 = vmatprep.subr.bf16.mxu1 %v735_v0  ;;  %158 = vmatprep.mubr.f32.mxu0 %v736_v1  ;;  %v65_v3 = vld [vmem:[#allocation5 + $0x20] sm:$0xff]  ;;  %v64_v6 = vld [vmem:[#allocation5 + $0x18] sm:$0xff]  ;;  %v71_v8 = vld [vmem:[#allocation5 + $0x50] sm:$0xff]  ;;  %vm90_vm1 = vcmask 261120   ;;  %s738_s8 = smov [#allocation8]  }
  0x39   :  { %515 = vmatprep.mubr.msk.f32.mxu1 %vm737_vm0, %v736_v1  ;;  %v61_v4 = vld [vmem:[#allocation5] sm:$0xff]  ;;  %v553_v5 = vpack.c.bf16 %v65_v3, %v62_v2  ;;  %v68_v7 = vld [vmem:[#allocation5 + $0x38] sm:$0xff]  ;;  %v67_v11 = vld [vmem:[#allocation5 + $0x30] sm:$0xff]  ;;  %s437_s9 = sshll.u32 %s738_s8, 4  ;;  %s438_s9 = int_to_ptr.vmem [resolvable:$true] %s437_s9 }
  0x3a   :  { %v555_v9 = vpack.c.bf16 %v64_v6, %v61_v4  ;;  %v557_v10 = vpack.c.bf16 %v71_v8, %v68_v7  ;;  %v70_v12 = vld [vmem:[#allocation5 + $0x48] sm:$0xff]  ;;  %v63_v13 = vld [vmem:[#allocation5 + $0x10] sm:$0xff]  ;;  %v69_v15 = vld [vmem:[#allocation5 + $0x40] sm:$0xff]  ;;  %s700_s10 = scalar_lea.vmem %s438_s9, 128  ;;  %p705_p11 = scmp.lt.s32.totalorder %s438_s9, %s438_s9 }
  0x3b   :  { %554 = vmatprep.subr.bf16.mxu0 %v553_v5  ;;  %v66_v14 = vld [vmem:[#allocation5 + $0x28] sm:$0xff]  ;;  %v559_v16 = vpack.c.bf16 %v70_v12, %v67_v11  ;;  %v72_v18 = vld [vmem:[#allocation5 + $0x58] sm:$0xff]  ;;  %v251_v19 = vld [vmem:[#allocation7 + $0x80] sm:$0xff]  ;;  %p701_p10 = scmp.ne.s32.totalorder %s438_s9, %s700_s10  ;;  %p706_p12 = scmp.lt.s32.totalorder %s700_s10, %s700_s10 }
  0x3c   :  { %556 = vmatpush1.bf16.msra.mxu0 %v555_v9  ;;  %v562_v17 = vpack.c.bf16 %v66_v14, %v63_v13  ;;  %v252_v20 = vld [vmem:[#allocation7 + $0x88] sm:$0xff]  ;;  %v235_v22 = vld [vmem:[#allocation7] sm:$0xff]  ;;  %v565_v24 = vpack.c.bf16 %v72_v18, %v69_v15  ;;  %v253_v25 = vld [vmem:[#allocation7 + $0x90] sm:$0xff] }
  0x3d   :  { %558 = vmatprep.subr.bf16.mxu0 %v557_v10  ;;  %v567_v21 = vpack.c.bf16 %v252_v20, %v251_v19  ;;  %v236_v23 = vld [vmem:[#allocation7 + $0x8] sm:$0xff]  ;;  %v254_v26 = vld [vmem:[#allocation7 + $0x98] sm:$0xff]  ;;  %v267_v27 = vld [vmem:[#allocation7 + $0x100] sm:$0xff]  ;;  %p707_p13 = por %p706_p12, %p705_p11 }
  0x3e   :  { %563 = vmatpush3.bf16.msra.mxu1 %v562_v17  ;;  %v268_v28 = vld [vmem:[#allocation7 + $0x108] sm:$0xff]  ;;  %v60_v29 = vld [vmem:[#allocation2] sm:$0xff]  ;;  %v569_v30 = vpack.c.bf16 %v236_v23, %v235_v22  ;;  %v571_v31 = vpack.c.bf16 %v254_v26, %v253_v25  ;;  %v237_v32 = vld [vmem:[#allocation7 + $0x10] sm:$0xff] }
  0x3f   :  { %564 = vmatprep.subr.bf16.mxu1 %v735_v0  ;;  %v238_v33 = vld [vmem:[#allocation7 + $0x18] sm:$0xff]  ;;  %v600_v34 = vpack.c.bf16 %v268_v28, %v267_v27  ;;  %v255_v35 = vld [vmem:[#allocation7 + $0xa0] sm:$0xff]  ;;  %v256_v36 = vld [vmem:[#allocation7 + $0xa8] sm:$0xff]  ;;  %p708_p0 = pnand %p707_p13, %p701_p10 }
  0x40   :  { %560 = vmatpush1.bf16.msra.mxu0 %v559_v16  ;;  %v269_v37 = vld [vmem:[#allocation7 + $0x110] sm:$0xff]  ;;  %v270_v38 = vld [vmem:[#allocation7 + $0x118] sm:$0xff]  ;;  %v573_v39 = vpack.c.bf16 %v238_v33, %v237_v32  ;;  %v575_v40 = vpack.c.bf16 %v256_v36, %v255_v35  ;;  %v239_v41 = vld [vmem:[#allocation7 + $0x20] sm:$0xff] }
  0x41   :  { %568 = vmatprep.subr.bf16.mxu0 %v567_v21  ;;  %v240_v42 = vld [vmem:[#allocation7 + $0x28] sm:$0xff]  ;;  %v603_v43 = vpack.c.bf16 %v270_v38, %v269_v37  ;;  %v257_v44 = vld [vmem:[#allocation7 + $0xb0] sm:$0xff]  ;;  %v258_v45 = vld [vmem:[#allocation7 + $0xb8] sm:$0xff] }
  0x42   :  { %566 = vmatpush3.bf16.msra.mxu1 %v565_v24  ;;  %v271_v46 = vld [vmem:[#allocation7 + $0x120] sm:$0xff]  ;;  %v272_v47 = vld [vmem:[#allocation7 + $0x128] sm:$0xff]  ;;  %v577_v48 = vpack.c.bf16 %v240_v42, %v239_v41  ;;  %v579_v49 = vpack.c.bf16 %v258_v45, %v257_v44  ;;  %v241_v50 = vld [vmem:[#allocation7 + $0x30] sm:$0xff] }
  0x43   :  { %447 = vmatmul.mubr.msk.f32.vlgmr.msra.gmra.mrb[0].mxu0 %vm90_vm1, %v60_v29  ;;  %599 = vmatprep.subr.bf16.mxu1 %v735_v0  ;;  %v242_v51 = vld [vmem:[#allocation7 + $0x38] sm:$0xff]  ;;  %v606_v52 = vpack.c.bf16 %v272_v47, %v271_v46  ;;  %v259_v53 = vld [vmem:[#allocation7 + $0xc0] sm:$0xff]  ;;  %v260_v54 = vld [vmem:[#allocation7 + $0xc8] sm:$0xff] }
  0x44   :  { %570 = vmatpush3.bf16.msra.mxu0 %v569_v30  ;;  %v273_v55 = vld [vmem:[#allocation7 + $0x130] sm:$0xff]  ;;  %v274_v56 = vld [vmem:[#allocation7 + $0x138] sm:$0xff]  ;;  %v581_v57 = vpack.c.bf16 %v242_v51, %v241_v50  ;;  %v583_v58 = vpack.c.bf16 %v260_v54, %v259_v53  ;;  %v243_v59 = vld [vmem:[#allocation7 + $0x40] sm:$0xff]  ;;  %v75_v30 = vlaneseq }
  0x45   :  { %516 = vmatmul.mubr.msk.f32.vlgmr.msra.gmra.mrb[0].mxu1 %vm90_vm1, %v60_v29  ;;  %572 = vmatprep.subr.bf16.mxu0 %v571_v31  ;;  %v244_v60 = vld [vmem:[#allocation7 + $0x48] sm:$0xff]  ;;  %v609_v61 = vpack.c.bf16 %v274_v56, %v273_v55  ;;  %v261_v62 = vld [vmem:[#allocation7 + $0xd0] sm:$0xff]  ;;  %v262_v63 = vld [vmem:[#allocation7 + $0xd8] sm:$0xff] }
  0x46   :  { %601 = vmatpush3.bf16.msra.mxu1 %v600_v34  ;;  %550 = vmatprep.mubr.msk.f32.mxu1 %vm737_vm0, %v736_v1  ;;  %v275_v1 = vld [vmem:[#allocation7 + $0x140] sm:$0xff]  ;;  %v276_v2 = vld [vmem:[#allocation7 + $0x148] sm:$0xff]  ;;  %v585_v3 = vpack.c.bf16 %v244_v60, %v243_v59  ;;  %v587_v4 = vpack.c.bf16 %v262_v63, %v261_v62  ;;  %v245_v5 = vld [vmem:[#allocation7 + $0x50] sm:$0xff]  ;;  %v76_v31 = vshrl.u32 %v75_v30, 7 }
  0x47   :  { %602 = vmatprep.subr.bf16.mxu1 %v735_v0  ;;  %v246_v6 = vld [vmem:[#allocation7 + $0x58] sm:$0xff]  ;;  %v612_v7 = vpack.c.bf16 %v276_v2, %v275_v1  ;;  %v263_v8 = vld [vmem:[#allocation7 + $0xe0] sm:$0xff]  ;;  %v264_v9 = vld [vmem:[#allocation7 + $0xe8] sm:$0xff] }
  0x48   :  { %574 = vmatpush3.bf16.msra.mxu0 %v573_v39  ;;  %v277_v10 = vld [vmem:[#allocation7 + $0x150] sm:$0xff]  ;;  %v278_v11 = vld [vmem:[#allocation7 + $0x158] sm:$0xff]  ;;  %v589_v12 = vpack.c.bf16 %v246_v6, %v245_v5  ;;  %v591_v13 = vpack.c.bf16 %v264_v9, %v263_v8  ;;  %v247_v14 = vld [vmem:[#allocation7 + $0x60] sm:$0xff]  ;;  %v81_v32 = vsub.s32 1, %v76_v31  ;;  %v77_v34 = vsub.s32 0, %v76_v31 }
  0x49   :  { %576 = vmatprep.subr.bf16.mxu0 %v575_v40  ;;  %v248_v15 = vld [vmem:[#allocation7 + $0x68] sm:$0xff]  ;;  %v615_v16 = vpack.c.bf16 %v278_v11, %v277_v10  ;;  %v265_v18 = vld [vmem:[#allocation7 + $0xf0] sm:$0xff]  ;;  %v266_v19 = vld [vmem:[#allocation7 + $0xf8] sm:$0xff]  ;;  %v85_v35 = vsub.s32 2, %v76_v31 }
  0x4a   :  { %604 = vmatpush3.bf16.msra.mxu1 %v603_v43  ;;  %v593_v17 = vpack.c.bf16 %v248_v15, %v247_v14  ;;  %v595_v20 = vpack.c.bf16 %v266_v19, %v265_v18  ;;  %v249_v21 = vld [vmem:[#allocation7 + $0x70] sm:$0xff]  ;;  %v250_v22 = vld [vmem:[#allocation7 + $0x78] sm:$0xff]  ;;  %v279_v23 = vld [vmem:[#allocation7 + $0x160] sm:$0xff] }
  0x4b   :  { %605 = vmatprep.subr.bf16.mxu1 %v735_v0  ;;  %v597_v24 = vpack.c.bf16 %v250_v22, %v249_v21  ;;  %v280_v25 = vld [vmem:[#allocation7 + $0x168] sm:$0xff]  ;;  %v281_v27 = vld [vmem:[#allocation7 + $0x170] sm:$0xff]  ;;  %v282_v28 = vld [vmem:[#allocation7 + $0x178] sm:$0xff] }
  0x4c   :  { %578 = vmatpush3.bf16.msra.mxu0 %v577_v48  ;;  %v618_v26 = vpack.c.bf16 %v280_v25, %v279_v23  ;;  %v621_v29 = vpack.c.bf16 %v282_v28, %v281_v27  ;;  %v73_v33 = vld [vmem:[%s842_s2] sm:$0x7] }
  0x4d   :  { %580 = vmatprep.subr.bf16.mxu0 %v579_v49  ;;  %v82_v36 = vrot.slane %v73_v33, %v81_v32  ;;  %v78_v37 = vrot.slane %v73_v33, %v77_v34  ;;  %v86_v38 = vrot.slane %v73_v33, %v85_v35  ;;  %v449_v48 = vld [vmem:[%s844_s4] ss:$0 sm:$0xff] }
  0x4e   :  { %607 = vmatpush3.bf16.msra.mxu1 %v606_v52 }
  0x4f   :  { %608 = vmatprep.subr.bf16.mxu1 %v735_v0 }
  0x50   :  { %582 = vmatpush3.bf16.msra.mxu0 %v581_v57 }
  0x51   :  { %584 = vmatprep.subr.bf16.mxu0 %v583_v58 }
  0x52   :  { %610 = vmatpush3.bf16.msra.mxu1 %v609_v61 }
  0x53   :  { %611 = vmatprep.subr.bf16.mxu1 %v735_v0 }
  0x54   :  { %586 = vmatpush3.bf16.msra.mxu0 %v585_v3 }
  0x55   :  { %588 = vmatprep.subr.bf16.mxu0 %v587_v4 }
  0x56   :  { %613 = vmatpush3.bf16.msra.mxu1 %v612_v7 }
  0x57   :  { %614 = vmatprep.subr.bf16.mxu1 %v735_v0 }
  0x58   :  { %590 = vmatpush3.bf16.msra.mxu0 %v589_v12 }
  0x59   :  { %592 = vmatprep.subr.bf16.mxu0 %v591_v13 }
  0x5a   :  { %616 = vmatpush3.bf16.msra.mxu1 %v615_v16 }
  0x5b   :  { %617 = vmatprep.subr.bf16.mxu1 %v735_v0 }
  0x5c   :  { %594 = vmatpush3.bf16.msra.mxu0 %v593_v17 }
  0x5d   :  { %596 = vmatprep.subr.bf16.mxu0 %v595_v20 }
  0x5e   :  { %619 = vmatpush3.bf16.msra.mxu1 %v618_v26 }
  0x5f   :  { %620 = vmatprep.subr.bf16.mxu1 %v735_v0 }
  0x60   :  { %598 = vmatpush3.bf16.msra.mxu0 %v597_v24 }
  0x62   :  { %622 = vmatpush3.bf16.msra.mxu1 %v621_v29 }
 0x116   :  { %v160_v39 = vpop.f32.mrb[0].mxu0 }
 0x117   :  { %v162_v40 = vpop.f32.mrb[1].mxu0  ;;  %v161_v43 = vadd.f32 %v160_v39, %v78_v37 }
 0x118   :  { %v163_v41 = vadd.f32 %v162_v40, %v82_v36  ;;  %v231_v42 = vpop.f32.mrb[0].mxu1 }
 0x119   :  { %v232_v0 = vadd.f32 %v231_v42, %v86_v38  ;;  %v517_v44 = vpop.f32.mrb[1].mxu1 }
 0x11a   :  { %354 = vmatprep.mubr.f32.mxu0 %v163_v41 }
 0x11b   :  { %355 = vmatmul.mubr.f32.vlgmr.msra.gmra.mrb[2].mxu0 %v161_v43  ;;  %551 = vmatmul.mubr.f32.vlgmr.msra.gmra.mrb[2].mxu1 %v232_v0 }
 0x1ee   :  { %v487_v45 = vpop.f32.mrb[2].mxu0  ;;  %v426_v46 = vpop.f32.mrb[2].mxu1 }
 0x1ef   :  { %v488_v47 = vpop.f32.mrb[3].mxu0  ;;  %v552_v49 = vpop.f32.mrb[3].mxu1 }
 0x1f0   :  { %v489_v50 = vadd.f32 %v488_v47, %v487_v45 }
 0x1f2   :  { %v357_v51 = vadd.f32 %v489_v50, %v449_v48 }
 0x1f4   :  { %v427_v52 = vadd.f32 %v426_v46, %v357_v51 }
 0x1f6   :  { %430 = vst [vmem:[#allocation8] sm:$0xff] %v427_v52 }
 0x1f7   :  { %711 = shalt.err (!%p708_p0)
}
 0x1f8   :  { %s712_s13 = scalar_lea.hbm %s845_s5, 128 }
 0x1f9   :  { %p713_p1 = scmp.ne.s32.totalorder %s845_s5, %s712_s13  ;;  %p716_p2 = scmp.lt.u32.totalorder %s712_s13, %s845_s5 }
 0x1fb   :  { %p718_p3 = pnand %p716_p2, %p713_p1 }
 0x1fd   :  { %721 = shalt.err (!%p718_p3)
}
 0x1fe   :  { %440 = dma.vmem_to_hbm [thread:$0]  %s438_s9, 128, %s845_s5, [#allocation4]  }
 0x1ff   :  { %726 = dma.done.wait [#allocation4], 128  }
 0x200   :  { %727 = vsyncadd [#allocation4], 4294967168 }
 0x201   :  { %444 = vsyncpa [#allocation3], 1 }
 0x202   :  { %445 = vsyncpa [#allocation6], 1 }
 0x203   :  { %446 = vsyncpa [#allocation4], 1 }

</bundles_post_ra>
